<compile_context>
chip_gen: v7x
topology: tpu7x:2x2x1
jax: 0.10.0
libtpu: 0.0.40
codegen_flags: <defaults>
</compile_context>

<pallas_src>
import functools

import jax
import jax.numpy as jnp
import numpy as np
from jax.experimental import pallas as pl
from jax.experimental.pallas import tpu as pltpu

EPS = 1e-5
LANE = 128


def _round_up(x, m):
    return (x + m - 1) // m * m


# ----------------------------- max-pool kernel ------------------------------ #

def _maxpool_kernel(x_ref, o_ref, *, C, Cp):
    # x_ref: (H2, 2, W2, 2*C) -- the 2x2 windows exposed by a free reshape.
    x = x_ref[...]
    v = jnp.maximum(x[:, 0], x[:, 1])               # vertical max   (H2, W2, 2C)
    out = jnp.maximum(v[:, :, :C], v[:, :, C:])     # horizontal max (H2, W2, C)
    if C == Cp:
        o_ref[0] = out
    else:                                           # zero-pad channels to lane width
        o_ref[...] = jnp.zeros(o_ref.shape, o_ref.dtype)
        o_ref[0, :, :, :C] = out


def maxpool2x2(x, cp):
    """x: [N, H, W, C] -> [N, H//2, W//2, cp] (channels zero-padded to cp)."""
    N, H, W, C = x.shape
    assert H % 2 == 0 and W % 2 == 0
    H2, W2 = H // 2, W // 2
    xr = x.reshape(N * H2, 2, W2, 2 * C)            # free row-major view, no copy
    return pl.pallas_call(
        functools.partial(_maxpool_kernel, C=C, Cp=cp),
        out_shape=jax.ShapeDtypeStruct((N, H2, W2, cp), x.dtype),
        grid=(N,),
        in_specs=[pl.BlockSpec((H2, 2, W2, 2 * C), lambda n: (n, 0, 0, 0))],
        out_specs=pl.BlockSpec((1, H2, W2, cp), lambda n: (n, 0, 0, 0)),
        compiler_params=pltpu.CompilerParams(dimension_semantics=("parallel",)),
    )(xr)


# ------------------------- fused BasicBlock kernel -------------------------- #

def _block_kernel(xp_ref, w1_ref, b1_ref, w2_ref, b2_ref, *rest,
                  T, H, W, Wo, Wt, has_proj):
    if has_proj:
        ws_ref, bs_ref, o_ref, h_ref = rest
    else:
        o_ref, h_ref = rest

    cin = xp_ref.shape[-1]
    cout = o_ref.shape[-1]
    r0 = pl.multiple_of(pl.program_id(1) * T, T)     # first output row of this tile

    # --- conv1 (+ folded bn1, + relu): h on an extended (T+2, Wt) halo region ---
    acc = None
    for k in range(9):
        dy, dx = divmod(k, 3)
        xs = xp_ref[0, pl.ds(r0 + dy, T + 2), pl.ds(dx, Wt), :]
        d = jnp.dot(xs.reshape((T + 2) * Wt, cin), w1_ref[k],
                    preferred_element_type=jnp.float32)
        acc = d if acc is None else acc + d
    h = jnp.maximum(acc + b1_ref[...], 0.0).reshape(T + 2, Wt, cout)
    # conv2 zero-pads h: zero out halo positions that fall outside the real image.
    ri = jax.lax.broadcasted_iota(jnp.int32, (T + 2, Wt, cout), 0) + (r0 - 1)
    ci = jax.lax.broadcasted_iota(jnp.int32, (T + 2, Wt, cout), 1)
    valid = (ri >= 0) & (ri < H) & (ci >= 1) & (ci <= W)
    h_ref[...] = jnp.where(valid, h, 0.0).astype(h_ref.dtype)

    # --- conv2 (+ folded bn2) ---
    acc2 = None
    for k in range(9):
        dy, dx = divmod(k, 3)
        hs = h_ref[dy:dy + T, dx:dx + Wo, :]
        d = jnp.dot(hs.reshape(T * Wo, cout), w2_ref[k],
                    preferred_element_type=jnp.float32)
        acc2 = d if acc2 is None else acc2 + d
    acc2 = acc2 + b2_ref[...]

    # --- shortcut (1x1 conv + bn, or identity), residual add, relu ---
    xc = xp_ref[0, pl.ds(r0 + 2, T), pl.ds(2, Wo), :].reshape(T * Wo, cin)
    if has_proj:
        sc = jnp.dot(xc, ws_ref[...], preferred_element_type=jnp.float32) + bs_ref[...]
    else:
        sc = xc.astype(jnp.float32)
    out = jnp.maximum(acc2 + sc, 0.0).reshape(T, Wo, cout)
    if Wo != W:
        out = out[:, :W, :]
    o_ref[0] = out.astype(o_ref.dtype)


def _fold_bn(bn):
    gamma, beta, mean, var = bn
    s = gamma / jnp.sqrt(var + EPS)
    return s, beta - mean * s


def _pack_conv3(w, scale, cin_p, cout_p, dtype):
    """[Cout, Cin, 3, 3] torch weight (BN scale folded) -> [9, Cin_p, Cout_p]."""
    cout, cin = w.shape[0], w.shape[1]
    wm = (jnp.transpose(w, (2, 3, 1, 0)) * scale).reshape(9, cin, cout)
    return jnp.pad(wm, ((0, 0), (0, cin_p - cin), (0, cout_p - cout))).astype(dtype)


def _pack_conv1(w, scale, cin_p, cout_p, dtype):
    cout, cin = w.shape[0], w.shape[1]
    wm = w[:, :, 0, 0].T * scale
    return jnp.pad(wm, ((0, cin_p - cin), (0, cout_p - cout))).astype(dtype)


def _pack_bias(b, cout_p):
    return jnp.pad(b, (0, cout_p - b.shape[0])).reshape(1, cout_p).astype(jnp.float32)


def _choose_row_tile(H, Wo, max_positions):
    t = 1
    for cand in range(1, H + 1):
        if H % cand == 0 and cand * Wo <= max_positions:
            t = cand
    return t


def basic_block(x, p, *, max_tile_positions):
    """Fused BasicBlock. x: [N, H, W, Cp_in] (channel-padded) -> [N, H, W, Cp_out]."""
    N, H, W, Cp_in = x.shape
    dtype = x.dtype
    cin, cout = p["w1"].shape[1], p["w1"].shape[0]
    assert _round_up(cin, LANE) == Cp_in
    Cp_out = _round_up(cout, LANE)
    has_proj = "ws" in p
    if not has_proj:
        assert Cp_in == Cp_out

    Wo = _round_up(W, 8)              # output cols computed per tile (8-aligned)
    Wt = _round_up(Wo + 2, 8)         # h cols computed per tile (>= W+2, 8-aligned)
    Wp = Wt + 2                       # padded input width
    T = _choose_row_tile(H, Wo, max_tile_positions)
    nt = H // T

    # Spatial halo pad (2 rows/cols; extra right pad only for 8-alignment).
    xp = jnp.pad(x, ((0, 0), (2, 2), (2, Wp - W - 2), (0, 0)))

    # Fold BN into weights, pad channels, cast MXU operands to the compute dtype.
    s1, b1 = _fold_bn(p["bn1"])
    s2, b2 = _fold_bn(p["bn2"])
    w1 = _pack_conv3(p["w1"], s1, Cp_in, Cp_out, dtype)
    w2 = _pack_conv3(p["w2"], s2, Cp_out, Cp_out, dtype)
    b1 = _pack_bias(b1, Cp_out)
    b2 = _pack_bias(b2, Cp_out)

    in_specs = [
        pl.BlockSpec((1, H + 4, Wp, Cp_in), lambda n, t: (n, 0, 0, 0)),
        pl.BlockSpec((9, Cp_in, Cp_out), lambda n, t: (0, 0, 0)),
        pl.BlockSpec((1, Cp_out), lambda n, t: (0, 0)),
        pl.BlockSpec((9, Cp_out, Cp_out), lambda n, t: (0, 0, 0)),
        pl.BlockSpec((1, Cp_out), lambda n, t: (0, 0)),
    ]
    args = [xp, w1, b1, w2, b2]
    if has_proj:
        ss, bs = _fold_bn(p["bns"])
        args += [_pack_conv1(p["ws"], ss, Cp_in, Cp_out, dtype),
                 _pack_bias(bs, Cp_out)]
        in_specs += [pl.BlockSpec((Cp_in, Cp_out), lambda n, t: (0, 0)),
                     pl.BlockSpec((1, Cp_out), lambda n, t: (0, 0))]

    kernel = functools.partial(_block_kernel, T=T, H=H, W=W, Wo=Wo, Wt=Wt,
                               has_proj=has_proj)
    return pl.pallas_call(
        kernel,
        out_shape=jax.ShapeDtypeStruct((N, H, W, Cp_out), dtype),
        grid=(N, nt),
        in_specs=in_specs,
        out_specs=pl.BlockSpec((1, T, W, Cp_out), lambda n, t: (n, t, 0, 0)),
        scratch_shapes=[pltpu.VMEM((T + 2, Wt, Cp_out), dtype)],
        compiler_params=pltpu.CompilerParams(
            dimension_semantics=("parallel", "parallel"),
            vmem_limit_bytes=48 * 1024 * 1024),
    )(*args)


# ------------------------------ public wrapper ------------------------------ #

def down_block_apply(x_nchw, params, *, pool=True, dtype=jnp.bfloat16,
                     max_tile_positions=2048):
    """down_block forward. [N, Cin, H, W] -> [N, Cout, H/2, W/2] (float32)."""
    if not pool:
        # TODO(synk): pool=False path (first BasicBlock with stride=2) not implemented.
        raise NotImplementedError("pool=False path not implemented")
    x = jnp.transpose(x_nchw, (0, 2, 3, 1)).astype(dtype)      # NCHW -> NHWC
    cin = params[0]["w1"].shape[1]
    x = maxpool2x2(x, _round_up(cin, LANE))
    for p in params:
        x = basic_block(x, p, max_tile_positions=max_tile_positions)
    cout = params[-1]["w1"].shape[0]
    x = x[..., :cout]                                          # strip channel pad
    return jnp.transpose(x, (0, 3, 1, 2)).astype(jnp.float32)  # back to NCHW


# ------------------------------ parameter init ------------------------------ #

def _make_bn(key, c):
    k1, k2, k3, k4 = jax.random.split(key, 4)
    gamma = 1.0 + 0.1 * jax.random.normal(k1, (c,), jnp.float32)
    beta = 0.1 * jax.random.normal(k2, (c,), jnp.float32)
    mean = 0.1 * jax.random.normal(k3, (c,), jnp.float32)
    var = 0.5 + 0.5 * jnp.abs(jax.random.normal(k4, (c,), jnp.float32))
    return (gamma, beta, mean, var)


def init_down_block_params(key, in_ch, out_ch, num_block):
    params = []
    ch = in_ch
    for i in range(num_block):
        ks = jax.random.split(jax.random.fold_in(key, i), 6)
        p = {
            "w1": 0.1 * jax.random.normal(ks[0], (out_ch, ch, 3, 3), jnp.float32),
            "bn1": _make_bn(ks[1], out_ch),
            "w2": 0.1 * jax.random.normal(ks[2], (out_ch, out_ch, 3, 3), jnp.float32),
            "bn2": _make_bn(ks[3], out_ch),
        }
        if ch != out_ch:
            p["ws"] = 0.1 * jax.random.normal(ks[4], (out_ch, ch, 1, 1), jnp.float32)
            p["bns"] = _make_bn(ks[5], out_ch)
        params.append(p)
        ch = out_ch
    return params


# ---------------------------- pure-JAX reference ----------------------------- #

def _ref_bn(x, bn):
    gamma, beta, mean, var = bn
    return (x - mean) / jnp.sqrt(var + EPS) * gamma + beta


def _ref_conv(x, w):
    kh = w.shape[2]
    pad = (kh - 1) // 2
    return jax.lax.conv_general_dilated(
        x, jnp.transpose(w, (2, 3, 1, 0)), window_strides=(1, 1),
        padding=[(pad, pad), (pad, pad)],
        dimension_numbers=("NHWC", "HWIO", "NHWC"),
        precision=jax.lax.Precision.HIGHEST)


def _ref_basic_block(x, p):
    h = jax.nn.relu(_ref_bn(_ref_conv(x, p["w1"]), p["bn1"]))
    h = _ref_bn(_ref_conv(h, p["w2"]), p["bn2"])
    sc = _ref_bn(_ref_conv(x, p["ws"]), p["bns"]) if "ws" in p else x
    return jax.nn.relu(h + sc)


def ref_down_block(x_nchw, params):
    x = jnp.transpose(x_nchw, (0, 2, 3, 1)).astype(jnp.float32)
    x = jax.lax.reduce_window(x, -jnp.inf, jax.lax.max,
                              (1, 2, 2, 1), (1, 2, 2, 1), "VALID")
    for p in params:
        x = _ref_basic_block(x, p)
    return jnp.transpose(x, (0, 3, 1, 2))


# ---------------------------------- main ------------------------------------ #

if __name__ == "__main__":
    key = jax.random.PRNGKey(0)
    kx, kp = jax.random.split(key)

    N, Cin, H, W = 2, 4, 16, 16
    Cout, num_block = 8, 2

    x = jax.random.normal(kx, (N, Cin, H, W), jnp.float32)
    params = init_down_block_params(kp, Cin, Cout, num_block)
    ref = ref_down_block(x, params)

    # f32 run: validates the fused-conv indexing / halo-masking / shortcut logic.
    # (max_tile_positions=32 forces multiple row tiles so the tiled path is tested.)
    out_f32 = jax.block_until_ready(
        down_block_apply(x, params, dtype=jnp.float32, max_tile_positions=32))
    assert out_f32.shape == (N, Cout, H // 2, W // 2)
    np.testing.assert_allclose(np.asarray(out_f32), np.asarray(ref),
                               atol=2e-2, rtol=2e-2)

    # bf16 run (default perf configuration: bf16 MXU operands, f32 accumulation).
    out_bf16 = jax.block_until_ready(
        down_block_apply(x, params, max_tile_positions=32))
    assert out_bf16.shape == (N, Cout, H // 2, W // 2)
    np.testing.assert_allclose(np.asarray(out_bf16), np.asarray(ref),
                               atol=8e-2, rtol=8e-2)

    print("KERNEL_OK")
</pallas_src>

<mosaic_0001>
module attributes {stable_mosaic.version = 11 : i64} {
  func.func @_maxpool_kernel(%arg0: i32, %arg1: memref<8x2x8x8xf32, #tpu.memory_space<vmem>>, %arg2: memref<1x8x8x128xf32, #tpu.memory_space<vmem>>) attributes {dimension_semantics = [#tpu.dimension_semantics<parallel>], iteration_bounds = array<i64: 2>, scalar_prefetch = 0 : i64, scratch_operands = 0 : i64, tpu.core_type = #tpu.core_type<tc>, window_params = [{transform_indices = @transform_0, window_bounds = array<i64: 8, 2, 8, 8>}, {transform_indices = @transform_1, window_bounds = array<i64: 1, 8, 8, 128>}]} {
    %c0 = arith.constant 0 : index
    %c0_0 = arith.constant 0 : index
    %c0_1 = arith.constant 0 : index
    %c0_2 = arith.constant 0 : index
    %0 = vector.load %arg1[%c0, %c0_0, %c0_1, %c0_2] : memref<8x2x8x8xf32, #tpu.memory_space<vmem>>, vector<8x2x8x8xf32>
    %1 = vector.extract_strided_slice %0 {offsets = [0, 0, 0, 0], sizes = [8, 1, 8, 8], strides = [1, 1, 1, 1]} : vector<8x2x8x8xf32> to vector<8x1x8x8xf32>
    %2 = vector.shape_cast %1 : vector<8x1x8x8xf32> to vector<8x8x8xf32>
    %3 = vector.extract_strided_slice %0 {offsets = [0, 1, 0, 0], sizes = [8, 1, 8, 8], strides = [1, 1, 1, 1]} : vector<8x2x8x8xf32> to vector<8x1x8x8xf32>
    %4 = vector.shape_cast %3 : vector<8x1x8x8xf32> to vector<8x8x8xf32>
    %5 = arith.maximumf %2, %4 : vector<8x8x8xf32>
    %6 = vector.extract_strided_slice %5 {offsets = [0, 0, 0], sizes = [8, 8, 4], strides = [1, 1, 1]} : vector<8x8x8xf32> to vector<8x8x4xf32>
    %7 = vector.extract_strided_slice %5 {offsets = [0, 0, 4], sizes = [8, 8, 4], strides = [1, 1, 1]} : vector<8x8x8xf32> to vector<8x8x4xf32>
    %8 = arith.maximumf %6, %7 : vector<8x8x4xf32>
    %cst = arith.constant 0.000000e+00 : f32
    %9 = vector.broadcast %cst : f32 to vector<1x8x8x128xf32>
    %c0_3 = arith.constant 0 : index
    %c0_4 = arith.constant 0 : index
    %c0_5 = arith.constant 0 : index
    %c0_6 = arith.constant 0 : index
    %10 = vector.load %arg2[%c0_3, %c0_4, %c0_5, %c0_6] : memref<1x8x8x128xf32, #tpu.memory_space<vmem>>, vector<1x8x8x128xf32>
    tpu.vector_store %arg2[%c0_3, %c0_4, %c0_5, %c0_6], %9 {strides = array<i32>} : memref<1x8x8x128xf32, #tpu.memory_space<vmem>>, vector<1x8x8x128xf32>,
    %c0_7 = arith.constant 0 : index
    %c0_8 = arith.constant 0 : index
    %c0_9 = arith.constant 0 : index
    %c0_10 = arith.constant 0 : index
    %11 = vector.load %arg2[%c0_7, %c0_8, %c0_9, %c0_10] : memref<1x8x8x128xf32, #tpu.memory_space<vmem>>, vector<1x8x8x4xf32>
    %12 = vector.shape_cast %11 : vector<1x8x8x4xf32> to vector<8x8x4xf32>
    %13 = vector.shape_cast %8 : vector<8x8x4xf32> to vector<1x8x8x4xf32>
    tpu.vector_store %arg2[%c0_7, %c0_8, %c0_9, %c0_10], %13 {strides = array<i32>} : memref<1x8x8x128xf32, #tpu.memory_space<vmem>>, vector<1x8x8x4xf32>,
    return
  }
  func.func @transform_0(%arg0: i32) -> (i32, i32, i32, i32) {
    %c0_i32 = arith.constant 0 : i32
    %c0_i32_0 = arith.constant 0 : i32
    %c0_i32_1 = arith.constant 0 : i32
    %c0_i32_2 = arith.constant 0 : i32
    return %arg0, %c0_i32, %c0_i32_0, %c0_i32_1 : i32, i32, i32, i32
  }
  func.func @transform_1(%arg0: i32) -> (i32, i32, i32, i32) {
    %c0_i32 = arith.constant 0 : i32
    %c0_i32_0 = arith.constant 0 : i32
    %c0_i32_1 = arith.constant 0 : i32
    %c0_i32_2 = arith.constant 0 : i32
    return %arg0, %c0_i32, %c0_i32_0, %c0_i32_1 : i32, i32, i32, i32
  }
}

</mosaic_0001>

<bundles_post_ra>
// kernel: tpu_custom_call.1
= control target key start
LH: loop header
LB: loop body
LE: loop exit
PB: predicated region body
PF: predicated region fallthrough
CT: control target
= control target key end

     0   :  { %6 = vsyncpa [#allocation3], 0  ;;  %s547_s0 = inlined_call_operand.vmem [shape: f32[16,2,8,8], index: 0, kind: input, shape index: {}]   ;;  %s548_s1 = inlined_call_operand.hbm [shape: f32[2,8,8,128], index: 1, kind: output, shape index: {}]  }
   0x1   :  { %8 = vsyncpa [#allocation3 + $0x1], 0  ;;  %s414_s6 = smov 0   ;;  %s416_s7 = smov 0  }
   0x2   :  { %s418_s8 = smov 0   ;;  %s420_s9 = smov 0  }
   0x3 LB: > { %s435_s10 = sadd.s32 4294967295, %s397_s9   ;;  %s277_s11 = sadd.s32 4294967294, %s397_s9   ;;  %s397_s9 = sphi %s420_s9, %s554_s9   ;;  %s393_s8 = sphi %s418_s8, %s553_s8   ;;  %s389_s7 = sphi %s416_s7, %s552_s7   ;;  %s385_s6 = sphi %s414_s6, %s551_s6  }
   0x4   : > { %s439_s12 = sadd.s32 1, %s397_s9   ;;  %s47_s13 = sadd.s32 1, %s393_s8 }
   0x5   : > { %s44_s14 = ssub.s32 %s397_s9, %s439_s12  ;;  %p57_p0 = scmp.ne.s32.totalorder %s393_s8, %s389_s7 }
   0x6   : > { %p45_p1 = scmp.eq.s32.totalorder %s44_s14, 0  ;;  %p58_p2 = scmp.eq.s32.totalorder %s435_s10, 1 }
   0x7   : > { %p63_p3 = scmp.ne.s32.totalorder %s389_s7, %s385_s6  ;;  %p64_p4 = scmp.eq.s32.totalorder %s277_s11, 1 }
   0x8   : > { %s450_s15 = scalar_select %p45_p1, %s393_s8, %s47_s13  }
   0x9   : > { %p452_p5 = por %p58_p2, %p57_p0  ;;  %p456_p6 = por %p64_p4, %p63_p3 }
   0xa   : > { %p280_p7 = scmp.ge.s32.totalorder %s397_s9, 1  ;;  %p92_p8 = scmp.lt.s32.totalorder %s397_s9, 3 }
   0xc   : > { %p93_p9 = pnand %p280_p7, %p92_p8 }
   0xd   : > { %s282_s18 = sshll.u32 (!%p93_p9), %s435_s10, 3  ;;  %s110_s19 = sand.u32 (!%p93_p9), 1, %s389_s7   ;;  %v399_v0 = vmov (!%p93_p9), 0.0   ;;  %vm192_vm0 = vcmask (!%p93_p9), 31744  }
   0xe   : > { %96 = sbr.rel (%p93_p9) target bundleno = 172 (0xac), region = 24  ;;  %p114_p10 = scmp.lt.s32.totalorder (!%p93_p9), %s282_s18, 15 }
   0xf   : > { %s281_s20 = sshll.u32 (!%p93_p9), %s110_s19, 6  ;;  %s400_s26 = smov (!%p93_p9), 124  }
  0x10   : > { %s466_s22 = scalar_lea.vmem (!%p93_p9), [#allocation2], %s281_s20  ;;  %s291_s27 = sshll.u32 (!%p93_p9), %s435_s10, 10 }
  0x11   : > { %186 = vst [vmem:[%s466_s22 + $0x10] sm:$0xff] (!%p93_p9), %v399_v0  ;;  %184 = vst [vmem:[%s466_s22] sm:$0xff] (!%p93_p9), %v399_v0  ;;  %s215_s28 = sshll.u32 (!%p93_p9), %s466_s22, 4  ;;  %s496_s2 = scalar_lea.hbm (!%p93_p9), %s548_s1, %s291_s27  ;;  %s498_s28 = int_to_ptr.vmem [resolvable:$true] %s215_s28 }
  0x12   : > { %185 = vst [vmem:[%s466_s22 + $0x8] sm:$0xff] (!%p93_p9), %v399_v0  ;;  %187 = vst [vmem:[%s466_s22 + $0x18] sm:$0xff] (!%p93_p9), %v399_v0  ;;  %s506_s3 = scalar_lea.sflag (!%p93_p9), [#allocation3], %s110_s19  ;;  %s335_s4 = scalar_lea.vmem (!%p93_p9), %s498_s28, 1024 }
  0x13   : > { %188 = vst [vmem:[%s466_s22 + $0x20] sm:$0xff] (!%p93_p9), %v399_v0  ;;  %189 = vst [vmem:[%s466_s22 + $0x28] sm:$0xff] (!%p93_p9), %v399_v0  ;;  %p336_p11 = scmp.ne.s32.totalorder (!%p93_p9), %s498_s28, %s335_s4  ;;  %s401_s5 = smov (!%p93_p9), [#allocation2]  }
  0x14   : > { %190 = vst [vmem:[%s466_s22 + $0x30] sm:$0xff] (!%p93_p9), %v399_v0  ;;  %191 = vst [vmem:[%s466_s22 + $0x38] sm:$0xff] (!%p93_p9), %v399_v0  ;;  %s339_s10 = sshll.u32 (!%p93_p9), %s401_s5, 4  ;;  %s340_s10 = int_to_ptr.vmem [resolvable:$false] %s339_s10 }
  0x15   : > { %s556_s18 = smov (!%p114_p10, %s282_s18), 15  ;;  %p337_p12 = pnand %p336_p11, %p452_p5 }
  0x16   : > { %s290_s21 = sshll.u32 %s556_s18, 4  ;;  %s341_s11 = scalar_lea.vmem %s340_s10, 2048 }
  0x17   : > { %s118_s25 = scalar_lea.vmem %s547_s0, %s290_s21  ;;  %p338_p13 = pneg %p337_p12 }
  0x18   : > { %v124_v1 = vld [vmem:[%s118_s25 + $0x20] sm:$0xff]  ;;  %v125_v2 = vld [vmem:[%s118_s25 + $0x28] sm:$0xff]  ;;  %v126_v6 = vld [vmem:[%s118_s25 + $0x30] sm:$0xff]  ;;  %p342_p0 = scmp.lt.s32.totalorder %s498_s28, %s340_s10  ;;  %p343_p1 = scmp.lt.s32.totalorder %s341_s11, %s335_s4 }
  0x19   : > { %v120_v3 = vld [vmem:[%s118_s25] sm:$0xff]  ;;  %v138_v4 = vmax.f32 %v124_v1, %v125_v2  ;;  %v121_v5 = vld [vmem:[%s118_s25 + $0x8] sm:$0xff]  ;;  %v127_v7 = vld [vmem:[%s118_s25 + $0x38] sm:$0xff] }
  0x1a   : > { %v136_v8 = vmax.f32 %v120_v3, %v121_v5  ;;  %v122_v9 = vld [vmem:[%s118_s25 + $0x10] sm:$0xff]  ;;  %v123_v10 = vld [vmem:[%s118_s25 + $0x18] sm:$0xff]  ;;  %v139_v11 = vmax.f32 %v126_v6, %v127_v7  ;;  %v128_v15 = vld [vmem:[%s118_s25 + $0x40] sm:$0xff]  ;;  %p344_p2 = por %p343_p1, %p342_p0 }
  0x1b   : > { %156 = vrot.lane.b32.xlu1 %v138_v4, %s400_s26  ;;  %v137_v12 = vmax.f32 %v122_v9, %v123_v10  ;;  %v130_v13 = vld [vmem:[%s118_s25 + $0x50] sm:$0xff]  ;;  %v131_v14 = vld [vmem:[%s118_s25 + $0x58] sm:$0xff]  ;;  %v129_v16 = vld [vmem:[%s118_s25 + $0x48] sm:$0xff] }
  0x1c   : > { %152 = vrot.lane.b32.xlu0 %v136_v8, %s400_s26  ;;  %v141_v17 = vmax.f32 %v130_v13, %v131_v14  ;;  %v140_v18 = vmax.f32 %v128_v15, %v129_v16  ;;  %v134_v19 = vld [vmem:[%s118_s25 + $0x70] sm:$0xff]  ;;  %v135_v20 = vld [vmem:[%s118_s25 + $0x78] sm:$0xff]  ;;  %v132_v21 = vld [vmem:[%s118_s25 + $0x60] sm:$0xff]  ;;  %p345_p3 = pnand %p344_p2, %p338_p13 }
  0x1d   : > { %v133_v22 = vld [vmem:[%s118_s25 + $0x68] sm:$0xff]  ;;  %v143_v23 = vmax.f32 %v134_v19, %v135_v20 }
  0x1e   : > { %v142_v24 = vmax.f32 %v132_v21, %v133_v22 }
  0x1f   : > { %158 = vrot.lane.b32.xlu1 %v139_v11, %s400_s26 }
  0x20   : > { %154 = vrot.lane.b32.xlu0 %v137_v12, %s400_s26 }
  0x23   : > { %162 = vrot.lane.b32.xlu1 %v141_v17, %s400_s26 }
  0x24   : > { %160 = vrot.lane.b32.xlu0 %v140_v18, %s400_s26 }
  0x27   : > { %166 = vrot.lane.b32.xlu1 %v143_v23, %s400_s26 }
  0x28   : > { %164 = vrot.lane.b32.xlu0 %v142_v24, %s400_s26 }
  0x8d   : > { %v157_v25 = vpop.permute.xlu1 %156 }
  0x8e   : > { %v178_v26 = vmax.f32 %v138_v4, %v157_v25  ;;  %v153_v27 = vpop.permute.xlu0 %152 }
  0x8f   : > { %v176_v28 = vmax.f32 %v136_v8, %v153_v27 }
  0x90   : > { %195 = vst.msk [vmem:[%s466_s22 + $0x10] sm:$0xff] %vm192_vm0, %v178_v26 }
  0x91   : > { %193 = vst.msk [vmem:[%s466_s22] sm:$0xff] %vm192_vm0, %v176_v28  ;;  %v159_v29 = vpop.permute.xlu1 %158 }
  0x92   : > { %v179_v30 = vmax.f32 %v139_v11, %v159_v29  ;;  %v155_v31 = vpop.permute.xlu0 %154 }
  0x93   : > { %v177_v32 = vmax.f32 %v137_v12, %v155_v31 }
  0x94   : > { %196 = vst.msk [vmem:[%s466_s22 + $0x18] sm:$0xff] %vm192_vm0, %v179_v30 }
  0x95   : > { %194 = vst.msk [vmem:[%s466_s22 + $0x8] sm:$0xff] %vm192_vm0, %v177_v32  ;;  %v163_v33 = vpop.permute.xlu1 %162 }
  0x96   : > { %v181_v34 = vmax.f32 %v141_v17, %v163_v33  ;;  %v161_v35 = vpop.permute.xlu0 %160 }
  0x97   : > { %v180_v36 = vmax.f32 %v140_v18, %v161_v35 }
  0x98   : > { %198 = vst.msk [vmem:[%s466_s22 + $0x28] sm:$0xff] %vm192_vm0, %v181_v34 }
  0x99   : > { %197 = vst.msk [vmem:[%s466_s22 + $0x20] sm:$0xff] %vm192_vm0, %v180_v36  ;;  %v167_v37 = vpop.permute.xlu1 %166 }
  0x9a   : > { %v183_v38 = vmax.f32 %v143_v23, %v167_v37  ;;  %v165_v39 = vpop.permute.xlu0 %164 }
  0x9b   : > { %v182_v40 = vmax.f32 %v142_v24, %v165_v39 }
  0x9c   : > { %200 = vst.msk [vmem:[%s466_s22 + $0x38] sm:$0xff] %vm192_vm0, %v183_v38 }
  0x9d   : > { %199 = vst.msk [vmem:[%s466_s22 + $0x30] sm:$0xff] %vm192_vm0, %v182_v40 }
  0x9e   : > { %348 = shalt.err (!%p345_p3)
}
  0x9f   : > { %s349_s13 = scalar_lea.hbm %s496_s2, 1024  ;;  %s353_s19 = scalar_lea.hbm %s548_s1, 2048 }
  0xa0   : > { %p350_p4 = scmp.ne.s32.totalorder %s496_s2, %s349_s13  ;;  %p354_p9 = scmp.lt.u32.totalorder %s496_s2, %s548_s1 }
  0xa1   : > { %p355_p10 = scmp.lt.u32.totalorder %s353_s19, %s349_s13  ;;  %p357_p12 = scmp.lt.u32.totalorder %s349_s13, %s496_s2 }
  0xa2   : > { %p351_p7 = pnand %p350_p4, %p452_p5 }
  0xa3   : > { %p356_p11 = por %p355_p10, %p354_p9 }
  0xa4   : > { %p352_p8 = pneg %p351_p7 }
  0xa5   : > { %p358_p13 = por %p357_p12, %p356_p11 }
  0xa7   : > { %p359_p0 = pnand %p358_p13, %p352_p8 }
  0xa9   : > { %362 = shalt.err (!%p359_p0)
}
  0xaa   : > { %s402_s22 = smov 128   ;;  %s403_s23 = smov 8  }
  0xab   : > { %292 = dma.vmem_to_hbm [thread:$0]  (%p452_p5), %s498_s28, 1024, %s496_s2, %s506_s3, %s402_s22, %s402_s22, %s403_s23  }
  0xac PF: > { %p298_p1 = scmp.ge.s32.totalorder %s397_s9, 2  ;;  %s230_s24 = sand.u32 1, %s385_s6  }
  0xad   : > { %s231_s25 = scalar_lea.sflag [#allocation3], %s230_s24 }
  0xae   : > { %p295_p2 = pnand %p298_p1, %p456_p6 }
  0xb0   : > { %380 = dma.done.wait (!%p295_p2), %s231_s25, 1024  }
  0xb1   : > { %382 = vsyncadd (!%p295_p2), %s231_s25, 4294966272  ;;  %p11_p3 = scmp.ge.s32.totalorder %s439_s12, 4   ;;  %s551_s6 = smov %s389_s7 }
  0xb2   : > { %s552_s7 = smov %s393_s8  ;;  %s553_s8 = smov %s450_s15 }
  0xb3   : > { %s554_s9 = smov %s439_s12  ;;  %13 = sbr.rel (!%p11_p3) target bundleno = 3 (0x3), region = 59 }
  0xba   :  { %236 = vsyncpa [#allocation3], 1 }
  0xbb   :  { %238 = vsyncpa [#allocation3 + $0x1], 1 }

</bundles_post_ra>
